<compile_context>
chip_gen: v5e
topology: v5e:2x2
jax: 0.10.0
libtpu: 0.0.40
codegen_flags: <defaults>
</compile_context>

<pallas_src>
import functools

import jax
import jax.numpy as jnp
from jax.experimental import pallas as pl
from jax.experimental.pallas import tpu as pltpu

IN_FEAT, H1, H2, OUT_FEAT = 4, 8, 4, 3
_NEG_SLOPE = 0.3

# Packed parameter layout inside a single (8, 24) f32 block:
#   cols  0:4   -> W1 (8,4)      col  4 -> b1 (8,)
#   cols  5:13  -> W2 (4,8)      col 13 -> b2 (4,)
#   cols 14:18  -> W3 (3,4)      col 18 -> b3 (3,)
_PACK_ROWS, _PACK_COLS = 8, 24

_LANE = 128
_MAX_TILE = 32768            # lanes per grid step; ~7 MiB double-buffered working set
_MIN_SPLIT_LANES = 1024      # >= this many padded lanes -> use >=2 grid steps (megacore)
_DISPATCH_THRESHOLD = 32768  # below this batch, fused XLA ops beat a kernel launch


def _leaky_relu(x):
    # For 0 < slope < 1, leaky_relu(x) == max(x, slope*x): 2 VALU ops instead of 3.
    return jnp.maximum(x, _NEG_SLOPE * x)


def _linear_t(w, b, x):
    """y = W @ x + b with batch on the lane axis.

    Contraction depth is 4 or 8, so this is an unrolled chain of VPU broadcast
    multiply-adds instead of an MXU matmul (which would run at <3% utilization
    and pay push/pop latency per tile).
    """
    n_out, n_in = w.shape
    acc = jnp.broadcast_to(b, (n_out, x.shape[1]))           # bias, lane-broadcast
    for k in range(n_in):                                     # tiny, fully unrolled
        # (n_out, 1) * (1, TILE_B) -> (n_out, TILE_B) broadcast mul+add on the VPU
        acc = acc + w[:, k:k + 1] * x[k:k + 1, :]
    return acc


def ann_kernel(x_ref, p_ref, o_ref):
    x = x_ref[...]                                            # (IN_FEAT, TILE_B)
    p = p_ref[...]                                            # (8, 24) packed params

    w1, b1 = p[:H1, 0:IN_FEAT],        p[:H1, IN_FEAT:IN_FEAT + 1]
    w2, b2 = p[:H2, 5:5 + H1],         p[:H2, 13:14]
    w3, b3 = p[:OUT_FEAT, 14:14 + H2], p[:OUT_FEAT, 18:19]

    h = _leaky_relu(_linear_t(w1, b1, x))                     # (H1, TILE_B)
    h = _leaky_relu(_linear_t(w2, b2, h))                     # (H2, TILE_B)
    o_ref[...] = _linear_t(w3, b3, h).astype(o_ref.dtype)     # (OUT_FEAT, TILE_B)


def _pack_params(p):
    pk = jnp.zeros((_PACK_ROWS, _PACK_COLS), jnp.float32)
    pk = pk.at[:H1, 0:IN_FEAT].set(p["w1"].astype(jnp.float32))
    pk = pk.at[:H1, IN_FEAT].set(p["b1"].astype(jnp.float32))
    pk = pk.at[:H2, 5:5 + H1].set(p["w2"].astype(jnp.float32))
    pk = pk.at[:H2, 13].set(p["b2"].astype(jnp.float32))
    pk = pk.at[:OUT_FEAT, 14:14 + H2].set(p["w3"].astype(jnp.float32))
    pk = pk.at[:OUT_FEAT, 18].set(p["b3"].astype(jnp.float32))
    return pk


def _round_up(n, m):
    return ((n + m - 1) // m) * m


def _choose_tiling(batch, max_tile=_MAX_TILE):
    """Pick (tile, padded_batch, n_steps).

    Balances per-grid-step overhead against zero-padding waste:
      * tile is a multiple of 128 (lane-dense stores) and capped at max_tile
        so the double-buffered working set stays far below every generation's
        scoped-VMEM limit (v7x: 64 MiB physical).
      * large batches get an EVEN number of >=2 steps so the "parallel" axis
        actually feeds both v7x TensorCores.
      * tile ~= round_up(cdiv(B, n_steps), 128), so padding never blows up to a
        full extra max_tile on unlucky batch sizes.
    """
    b128 = _round_up(max(batch, 1), _LANE)
    if b128 <= max_tile:
        n_steps = 2 if b128 >= _MIN_SPLIT_LANES else 1
    else:
        n_steps = -(-b128 // max_tile)
        if n_steps % 2:
            n_steps += 1
    tile = _round_up(-(-b128 // n_steps), _LANE)
    return tile, tile * n_steps, n_steps


def ann_forward_pallas_t(xt, params, max_tile=_MAX_TILE):
    """Feature-major path: xt is (IN_FEAT, B) f32; returns (OUT_FEAT, B) f32.

    Callers that can produce/consume feature-major activations use this entry
    point directly and skip the batch-major pad/transpose round trips.
    """
    _, B = xt.shape
    tile, b_pad, _ = _choose_tiling(B, max_tile)
    xt = xt.astype(jnp.float32)
    if b_pad != B:
        xt = jnp.pad(xt, ((0, 0), (0, b_pad - B)))
    pk = _pack_params(params)

    out_t = pl.pallas_call(
        ann_kernel,
        out_shape=jax.ShapeDtypeStruct((OUT_FEAT, b_pad), jnp.float32),
        grid=(b_pad // tile,),
        in_specs=[
            pl.BlockSpec((IN_FEAT, tile), lambda i: (0, i)),            # x tile
            pl.BlockSpec((_PACK_ROWS, _PACK_COLS), lambda i: (0, 0)),   # params (resident)
        ],
        out_specs=pl.BlockSpec((OUT_FEAT, tile), lambda i: (0, i)),
        compiler_params=pltpu.CompilerParams(
            dimension_semantics=("parallel",),   # megacore: batch axis over both TCs
            vmem_limit_bytes=32 * 1024 * 1024,   # explicit, with headroom on all gens
        ),
    )(xt, pk)

    return out_t[:, :B] if b_pad != B else out_t


@functools.partial(jax.jit, static_argnames=("max_tile",))
def ann_forward_pallas(x, params, max_tile=_MAX_TILE):
    """Batch-major wrapper: x is (B, in_feat); returns (B, out_feat).

    Slices before transposing on the way out so the XLA transpose only touches
    the live rows.
    """
    out_t = ann_forward_pallas_t(x.astype(jnp.float32).T, params, max_tile)
    return out_t.T                                            # (B, OUT_FEAT)


def ann_reference(x, p):
    """Pure-JAX reference matching the PyTorch forward (torch weight layout)."""
    h = jax.nn.leaky_relu(x @ p["w1"].T + p["b1"], negative_slope=_NEG_SLOPE)
    h = jax.nn.leaky_relu(h @ p["w2"].T + p["b2"], negative_slope=_NEG_SLOPE)
    return h @ p["w3"].T + p["b3"]


def ann_forward(x, params, *, batch_threshold=_DISPATCH_THRESHOLD):
    """Dispatcher: small/medium batches are cheaper as fused XLA ops than a
    pallas_call launch + wrapper copies for this 4-wide MLP."""
    if x.shape[0] < batch_threshold:
        return ann_reference(x, params)
    return ann_forward_pallas(x, params)


def init_params(key, in_feat=IN_FEAT, hidden_units_1=H1, hidden_units_2=H2,
                out_feat=OUT_FEAT):
    """nn.Linear-style U(-1/sqrt(fan_in), 1/sqrt(fan_in)) init, torch layout (out, in)."""
    ks = jax.random.split(key, 6)

    def linear(kw, kb, fan_in, fan_out):
        bound = 1.0 / jnp.sqrt(float(fan_in))
        w = jax.random.uniform(kw, (fan_out, fan_in), jnp.float32, -bound, bound)
        b = jax.random.uniform(kb, (fan_out,), jnp.float32, -bound, bound)
        return w, b

    w1, b1 = linear(ks[0], ks[1], in_feat, hidden_units_1)
    w2, b2 = linear(ks[2], ks[3], hidden_units_1, hidden_units_2)
    w3, b3 = linear(ks[4], ks[5], hidden_units_2, out_feat)
    return {"w1": w1, "b1": b1, "w2": w2, "b2": b2, "w3": w3, "b3": b3}


if __name__ == "__main__":
    key = jax.random.PRNGKey(0)
    k_x, k_p = jax.random.split(key)
    params = init_params(k_p)

    # Exercise the Pallas kernel at a tiny padded batch, a lane-aligned single
    # step, and a 2-step grid (the "parallel"/megacore path).
    for B in (2, 256, 1024):
        x = jax.random.normal(jax.random.fold_in(k_x, B), (B, IN_FEAT), jnp.float32)
        out = jax.block_until_ready(ann_forward_pallas(x, params))
        ref = ann_reference(x, params)
        assert out.shape == (B, OUT_FEAT), out.shape
        assert jnp.allclose(out, ref, atol=1e-5, rtol=1e-5), (out, ref)

    # Exercise the dispatcher once (small batch -> pure-JAX path).
    x_small = jax.random.normal(k_x, (2, IN_FEAT), jnp.float32)
    _ = jax.block_until_ready(ann_forward(x_small, params))

    print("KERNEL_OK")
</pallas_src>

<mosaic_0001>
module attributes {stable_mosaic.version = 11 : i64} {
  func.func @ann_kernel(%arg0: i32, %arg1: memref<4x128xf32, #tpu.memory_space<vmem>>, %arg2: memref<8x24xf32, #tpu.memory_space<vmem>>, %arg3: memref<3x128xf32, #tpu.memory_space<vmem>>) attributes {dimension_semantics = [#tpu.dimension_semantics<parallel>], iteration_bounds = array<i64: 1>, scalar_prefetch = 0 : i64, scratch_operands = 0 : i64, tpu.core_type = #tpu.core_type<tc>, window_params = [{transform_indices = @transform_0, window_bounds = array<i64: 4, 128>}, {pipeline_mode = #tpu.pipeline_mode<synchronous>, transform_indices = @transform_1, window_bounds = array<i64: 8, 24>}, {transform_indices = @transform_2, window_bounds = array<i64: 3, 128>}]} {
    %c0 = arith.constant 0 : index
    %c0_0 = arith.constant 0 : index
    %0 = vector.load %arg1[%c0, %c0_0] : memref<4x128xf32, #tpu.memory_space<vmem>>, vector<4x128xf32>
    %c0_1 = arith.constant 0 : index
    %c0_2 = arith.constant 0 : index
    %1 = vector.load %arg2[%c0_1, %c0_2] : memref<8x24xf32, #tpu.memory_space<vmem>>, vector<8x24xf32>
    %2 = vector.extract_strided_slice %1 {offsets = [0, 0], sizes = [8, 4], strides = [1, 1]} : vector<8x24xf32> to vector<8x4xf32>
    %3 = vector.extract_strided_slice %1 {offsets = [0, 4], sizes = [8, 1], strides = [1, 1]} : vector<8x24xf32> to vector<8x1xf32>
    %4 = vector.extract_strided_slice %1 {offsets = [0, 5], sizes = [4, 8], strides = [1, 1]} : vector<8x24xf32> to vector<4x8xf32>
    %5 = vector.extract_strided_slice %1 {offsets = [0, 13], sizes = [4, 1], strides = [1, 1]} : vector<8x24xf32> to vector<4x1xf32>
    %6 = vector.extract_strided_slice %1 {offsets = [0, 14], sizes = [3, 4], strides = [1, 1]} : vector<8x24xf32> to vector<3x4xf32>
    %7 = vector.extract_strided_slice %1 {offsets = [0, 18], sizes = [3, 1], strides = [1, 1]} : vector<8x24xf32> to vector<3x1xf32>
    %8 = vector.shape_cast %3 : vector<8x1xf32> to vector<8x1xf32>
    %9 = vector.broadcast %8 : vector<8x1xf32> to vector<8x128xf32>
    %10 = vector.extract_strided_slice %2 {offsets = [0, 0], sizes = [8, 1], strides = [1, 1]} : vector<8x4xf32> to vector<8x1xf32>
    %11 = vector.extract_strided_slice %0 {offsets = [0, 0], sizes = [1, 128], strides = [1, 1]} : vector<4x128xf32> to vector<1x128xf32>
    %12 = vector.broadcast %10 : vector<8x1xf32> to vector<8x128xf32>
    %13 = vector.broadcast %11 : vector<1x128xf32> to vector<8x128xf32>
    %14 = arith.mulf %12, %13 : vector<8x128xf32>
    %15 = arith.addf %9, %14 : vector<8x128xf32>
    %16 = vector.extract_strided_slice %2 {offsets = [0, 1], sizes = [8, 1], strides = [1, 1]} : vector<8x4xf32> to vector<8x1xf32>
    %17 = vector.extract_strided_slice %0 {offsets = [1, 0], sizes = [1, 128], strides = [1, 1]} : vector<4x128xf32> to vector<1x128xf32>
    %18 = vector.broadcast %16 : vector<8x1xf32> to vector<8x128xf32>
    %19 = vector.broadcast %17 : vector<1x128xf32> to vector<8x128xf32>
    %20 = arith.mulf %18, %19 : vector<8x128xf32>
    %21 = arith.addf %15, %20 : vector<8x128xf32>
    %22 = vector.extract_strided_slice %2 {offsets = [0, 2], sizes = [8, 1], strides = [1, 1]} : vector<8x4xf32> to vector<8x1xf32>
    %23 = vector.extract_strided_slice %0 {offsets = [2, 0], sizes = [1, 128], strides = [1, 1]} : vector<4x128xf32> to vector<1x128xf32>
    %24 = vector.broadcast %22 : vector<8x1xf32> to vector<8x128xf32>
    %25 = vector.broadcast %23 : vector<1x128xf32> to vector<8x128xf32>
    %26 = arith.mulf %24, %25 : vector<8x128xf32>
    %27 = arith.addf %21, %26 : vector<8x128xf32>
    %28 = vector.extract_strided_slice %2 {offsets = [0, 3], sizes = [8, 1], strides = [1, 1]} : vector<8x4xf32> to vector<8x1xf32>
    %29 = vector.extract_strided_slice %0 {offsets = [3, 0], sizes = [1, 128], strides = [1, 1]} : vector<4x128xf32> to vector<1x128xf32>
    %30 = vector.broadcast %28 : vector<8x1xf32> to vector<8x128xf32>
    %31 = vector.broadcast %29 : vector<1x128xf32> to vector<8x128xf32>
    %32 = arith.mulf %30, %31 : vector<8x128xf32>
    %33 = arith.addf %27, %32 : vector<8x128xf32>
    %cst = arith.constant 3.000000e-01 : f32
    %34 = vector.broadcast %cst : f32 to vector<8x128xf32>
    %35 = arith.mulf %34, %33 : vector<8x128xf32>
    %36 = arith.maximumf %33, %35 : vector<8x128xf32>
    %37 = vector.shape_cast %5 : vector<4x1xf32> to vector<4x1xf32>
    %38 = vector.broadcast %37 : vector<4x1xf32> to vector<4x128xf32>
    %39 = vector.extract_strided_slice %4 {offsets = [0, 0], sizes = [4, 1], strides = [1, 1]} : vector<4x8xf32> to vector<4x1xf32>
    %40 = vector.extract_strided_slice %36 {offsets = [0, 0], sizes = [1, 128], strides = [1, 1]} : vector<8x128xf32> to vector<1x128xf32>
    %41 = vector.broadcast %39 : vector<4x1xf32> to vector<4x128xf32>
    %42 = vector.broadcast %40 : vector<1x128xf32> to vector<4x128xf32>
    %43 = arith.mulf %41, %42 : vector<4x128xf32>
    %44 = arith.addf %38, %43 : vector<4x128xf32>
    %45 = vector.extract_strided_slice %4 {offsets = [0, 1], sizes = [4, 1], strides = [1, 1]} : vector<4x8xf32> to vector<4x1xf32>
    %46 = vector.extract_strided_slice %36 {offsets = [1, 0], sizes = [1, 128], strides = [1, 1]} : vector<8x128xf32> to vector<1x128xf32>
    %47 = vector.broadcast %45 : vector<4x1xf32> to vector<4x128xf32>
    %48 = vector.broadcast %46 : vector<1x128xf32> to vector<4x128xf32>
    %49 = arith.mulf %47, %48 : vector<4x128xf32>
    %50 = arith.addf %44, %49 : vector<4x128xf32>
    %51 = vector.extract_strided_slice %4 {offsets = [0, 2], sizes = [4, 1], strides = [1, 1]} : vector<4x8xf32> to vector<4x1xf32>
    %52 = vector.extract_strided_slice %36 {offsets = [2, 0], sizes = [1, 128], strides = [1, 1]} : vector<8x128xf32> to vector<1x128xf32>
    %53 = vector.broadcast %51 : vector<4x1xf32> to vector<4x128xf32>
    %54 = vector.broadcast %52 : vector<1x128xf32> to vector<4x128xf32>
    %55 = arith.mulf %53, %54 : vector<4x128xf32>
    %56 = arith.addf %50, %55 : vector<4x128xf32>
    %57 = vector.extract_strided_slice %4 {offsets = [0, 3], sizes = [4, 1], strides = [1, 1]} : vector<4x8xf32> to vector<4x1xf32>
    %58 = vector.extract_strided_slice %36 {offsets = [3, 0], sizes = [1, 128], strides = [1, 1]} : vector<8x128xf32> to vector<1x128xf32>
    %59 = vector.broadcast %57 : vector<4x1xf32> to vector<4x128xf32>
    %60 = vector.broadcast %58 : vector<1x128xf32> to vector<4x128xf32>
    %61 = arith.mulf %59, %60 : vector<4x128xf32>
    %62 = arith.addf %56, %61 : vector<4x128xf32>
    %63 = vector.extract_strided_slice %4 {offsets = [0, 4], sizes = [4, 1], strides = [1, 1]} : vector<4x8xf32> to vector<4x1xf32>
    %64 = vector.extract_strided_slice %36 {offsets = [4, 0], sizes = [1, 128], strides = [1, 1]} : vector<8x128xf32> to vector<1x128xf32>
    %65 = vector.broadcast %63 : vector<4x1xf32> to vector<4x128xf32>
    %66 = vector.broadcast %64 : vector<1x128xf32> to vector<4x128xf32>
    %67 = arith.mulf %65, %66 : vector<4x128xf32>
    %68 = arith.addf %62, %67 : vector<4x128xf32>
    %69 = vector.extract_strided_slice %4 {offsets = [0, 5], sizes = [4, 1], strides = [1, 1]} : vector<4x8xf32> to vector<4x1xf32>
    %70 = vector.extract_strided_slice %36 {offsets = [5, 0], sizes = [1, 128], strides = [1, 1]} : vector<8x128xf32> to vector<1x128xf32>
    %71 = vector.broadcast %69 : vector<4x1xf32> to vector<4x128xf32>
    %72 = vector.broadcast %70 : vector<1x128xf32> to vector<4x128xf32>
    %73 = arith.mulf %71, %72 : vector<4x128xf32>
    %74 = arith.addf %68, %73 : vector<4x128xf32>
    %75 = vector.extract_strided_slice %4 {offsets = [0, 6], sizes = [4, 1], strides = [1, 1]} : vector<4x8xf32> to vector<4x1xf32>
    %76 = vector.extract_strided_slice %36 {offsets = [6, 0], sizes = [1, 128], strides = [1, 1]} : vector<8x128xf32> to vector<1x128xf32>
    %77 = vector.broadcast %75 : vector<4x1xf32> to vector<4x128xf32>
    %78 = vector.broadcast %76 : vector<1x128xf32> to vector<4x128xf32>
    %79 = arith.mulf %77, %78 : vector<4x128xf32>
    %80 = arith.addf %74, %79 : vector<4x128xf32>
    %81 = vector.extract_strided_slice %4 {offsets = [0, 7], sizes = [4, 1], strides = [1, 1]} : vector<4x8xf32> to vector<4x1xf32>
    %82 = vector.extract_strided_slice %36 {offsets = [7, 0], sizes = [1, 128], strides = [1, 1]} : vector<8x128xf32> to vector<1x128xf32>
    %83 = vector.broadcast %81 : vector<4x1xf32> to vector<4x128xf32>
    %84 = vector.broadcast %82 : vector<1x128xf32> to vector<4x128xf32>
    %85 = arith.mulf %83, %84 : vector<4x128xf32>
    %86 = arith.addf %80, %85 : vector<4x128xf32>
    %cst_3 = arith.constant 3.000000e-01 : f32
    %87 = vector.broadcast %cst_3 : f32 to vector<4x128xf32>
    %88 = arith.mulf %87, %86 : vector<4x128xf32>
    %89 = arith.maximumf %86, %88 : vector<4x128xf32>
    %90 = vector.shape_cast %7 : vector<3x1xf32> to vector<3x1xf32>
    %91 = vector.broadcast %90 : vector<3x1xf32> to vector<3x128xf32>
    %92 = vector.extract_strided_slice %6 {offsets = [0, 0], sizes = [3, 1], strides = [1, 1]} : vector<3x4xf32> to vector<3x1xf32>
    %93 = vector.extract_strided_slice %89 {offsets = [0, 0], sizes = [1, 128], strides = [1, 1]} : vector<4x128xf32> to vector<1x128xf32>
    %94 = vector.broadcast %92 : vector<3x1xf32> to vector<3x128xf32>
    %95 = vector.broadcast %93 : vector<1x128xf32> to vector<3x128xf32>
    %96 = arith.mulf %94, %95 : vector<3x128xf32>
    %97 = arith.addf %91, %96 : vector<3x128xf32>
    %98 = vector.extract_strided_slice %6 {offsets = [0, 1], sizes = [3, 1], strides = [1, 1]} : vector<3x4xf32> to vector<3x1xf32>
    %99 = vector.extract_strided_slice %89 {offsets = [1, 0], sizes = [1, 128], strides = [1, 1]} : vector<4x128xf32> to vector<1x128xf32>
    %100 = vector.broadcast %98 : vector<3x1xf32> to vector<3x128xf32>
    %101 = vector.broadcast %99 : vector<1x128xf32> to vector<3x128xf32>
    %102 = arith.mulf %100, %101 : vector<3x128xf32>
    %103 = arith.addf %97, %102 : vector<3x128xf32>
    %104 = vector.extract_strided_slice %6 {offsets = [0, 2], sizes = [3, 1], strides = [1, 1]} : vector<3x4xf32> to vector<3x1xf32>
    %105 = vector.extract_strided_slice %89 {offsets = [2, 0], sizes = [1, 128], strides = [1, 1]} : vector<4x128xf32> to vector<1x128xf32>
    %106 = vector.broadcast %104 : vector<3x1xf32> to vector<3x128xf32>
    %107 = vector.broadcast %105 : vector<1x128xf32> to vector<3x128xf32>
    %108 = arith.mulf %106, %107 : vector<3x128xf32>
    %109 = arith.addf %103, %108 : vector<3x128xf32>
    %110 = vector.extract_strided_slice %6 {offsets = [0, 3], sizes = [3, 1], strides = [1, 1]} : vector<3x4xf32> to vector<3x1xf32>
    %111 = vector.extract_strided_slice %89 {offsets = [3, 0], sizes = [1, 128], strides = [1, 1]} : vector<4x128xf32> to vector<1x128xf32>
    %112 = vector.broadcast %110 : vector<3x1xf32> to vector<3x128xf32>
    %113 = vector.broadcast %111 : vector<1x128xf32> to vector<3x128xf32>
    %114 = arith.mulf %112, %113 : vector<3x128xf32>
    %115 = arith.addf %109, %114 : vector<3x128xf32>
    %c0_4 = arith.constant 0 : index
    %c0_5 = arith.constant 0 : index
    %116 = vector.load %arg3[%c0_4, %c0_5] : memref<3x128xf32, #tpu.memory_space<vmem>>, vector<3x128xf32>
    tpu.vector_store %arg3[%c0_4, %c0_5], %115 {strides = array<i32>} : memref<3x128xf32, #tpu.memory_space<vmem>>, vector<3x128xf32>,
    return
  }
  func.func @transform_0(%arg0: i32) -> (i32, i32) {
    %c0_i32 = arith.constant 0 : i32
    %c0_i32_0 = arith.constant 0 : i32
    return %c0_i32, %arg0 : i32, i32
  }
  func.func @transform_1(%arg0: i32) -> (i32, i32) {
    %c0_i32 = arith.constant 0 : i32
    %c0_i32_0 = arith.constant 0 : i32
    %c0_i32_1 = arith.constant 0 : i32
    return %c0_i32, %c0_i32_0 : i32, i32
  }
  func.func @transform_2(%arg0: i32) -> (i32, i32) {
    %c0_i32 = arith.constant 0 : i32
    %c0_i32_0 = arith.constant 0 : i32
    return %c0_i32, %arg0 : i32, i32
  }
}

</mosaic_0001>

<bundles_post_ra>
// kernel: ann_forward_pallas.1
= control target key start
LH: loop header
LB: loop body
LE: loop exit
PB: predicated region body
PF: predicated region fallthrough
CT: control target
= control target key end

     0   :  { %v185_v0 = vmov 1   ;;  %v186_v1 = vmov 4   ;;  %v187_v3 = vmov 3   ;;  %v188_v4 = vmov 2   ;;  %s228_s1 = inlined_call_operand.vmem [shape: f32[8,24], index: 1, kind: input, shape index: {}]   ;;  %s229_s0 = inlined_call_operand.vmem [shape: f32[4,128], index: 0, kind: input, shape index: {}]   ;;  %s230_s2 = inlined_call_operand.vmem [shape: f32[3,128], index: 2, kind: output, shape index: {}]  }
   0x1   :  { %168 = vset.pattern.permute.xlu1 %v185_v0  ;;  %166 = vset.pattern.permute.xlu0 %v186_v1  ;;  %v12_v2 = vld [vmem:[%s228_s1] sm:$0xff]  ;;  %v189_v5 = vmov 0   ;;  %v190_v6 = vmov 13   ;;  %v191_v7 = vmov 5   ;;  %v192_v8 = vmov 7  }
   0x2   :  { %26 = vperm.xlu1 %168, %v12_v2   ;;  %15 = vperm.xlu0 %166, %v12_v2   ;;  %v193_v9 = vmov 6   ;;  %v194_v10 = vmov 8   ;;  %v195_v11 = vmov 12   ;;  %v196_v12 = vmov 9   ;;  %v11_v23 = vld [vmem:[%s229_s0] sm:$0xf] }
   0x3   :  { %170 = vset.pattern.permute.xlu2 %v187_v3  ;;  %v197_v13 = vmov 10   ;;  %v198_v14 = vmov 17   ;;  %v199_v15 = vmov 11   ;;  %v200_v16 = vmov 14  }
   0x4   :  { %40 = vperm.xlu2 %170, %v12_v2   ;;  %v201_v17 = vmov 18   ;;  %v202_v18 = vmov 15   ;;  %v203_v19 = vmov 16   ;;  %v22_v25 = vperm.slane %v11_v23, 0 }
   0x5   :  { %v29_v26 = vperm.slane %v11_v23, 1  ;;  %v36_v29 = vperm.slane %v11_v23, 2  ;;  %v43_v31 = vperm.slane %v11_v23, 3 }
   0xa   :  { %169 = vset.pattern.permute.xlu1 %v188_v4  ;;  %167 = vset.pattern.permute.xlu0 %v189_v5 }
   0xb   :  { %33 = vperm.xlu1 %169, %v12_v2   ;;  %19 = vperm.xlu0 %167, %v12_v2  }
   0xc   :  { %171 = vset.pattern.permute.xlu2 %v190_v6 }
   0xd   :  { %49 = vperm.xlu2 %171, %v12_v2  }
  0x13   :  { %172 = vset.pattern.permute.xlu1 %v191_v7  ;;  %174 = vset.pattern.permute.xlu0 %v192_v8 }
  0x14   :  { %53 = vperm.xlu1 %172, %v12_v2   ;;  %67 = vperm.xlu0 %174, %v12_v2  }
  0x15   :  { %173 = vset.pattern.permute.xlu2 %v193_v9 }
  0x16   :  { %60 = vperm.xlu2 %173, %v12_v2  }
  0x1c   :  { %175 = vset.pattern.permute.xlu1 %v194_v10  ;;  %179 = vset.pattern.permute.xlu0 %v195_v11 }
  0x1d   :  { %74 = vperm.xlu1 %175, %v12_v2   ;;  %102 = vperm.xlu0 %179, %v12_v2  }
  0x1e   :  { %176 = vset.pattern.permute.xlu2 %v196_v12 }
  0x1f   :  { %81 = vperm.xlu2 %176, %v12_v2  }
  0x25   :  { %177 = vset.pattern.permute.xlu1 %v197_v13  ;;  %184 = vset.pattern.permute.xlu0 %v198_v14 }
  0x26   :  { %88 = vperm.xlu1 %177, %v12_v2   ;;  %136 = vperm.xlu0 %184, %v12_v2  }
  0x27   :  { %178 = vset.pattern.permute.xlu2 %v199_v15 }
  0x28   :  { %95 = vperm.xlu2 %178, %v12_v2  }
  0x2e   :  { %180 = vset.pattern.permute.xlu1 %v200_v16 }
  0x2f   :  { %115 = vperm.xlu1 %180, %v12_v2  }
  0x30   :  { %181 = vset.pattern.permute.xlu2 %v201_v17 }
  0x31   :  { %111 = vperm.xlu2 %181, %v12_v2  }
  0x37   :  { %182 = vset.pattern.permute.xlu1 %v202_v18 }
  0x38   :  { %122 = vperm.xlu1 %182, %v12_v2  }
  0x39   :  { %183 = vset.pattern.permute.xlu2 %v203_v19 }
  0x3a   :  { %129 = vperm.xlu2 %183, %v12_v2  }
  0x5e   :  { %v41_v20 = vpop.permute.xlu2 %40 }
  0x5f   :  { %v44_v36 = vmul.f32 %v43_v31, %v41_v20 }
  0x67   :  { %v50_v24 = vpop.permute.xlu2 %49 }
  0x70   :  { %v61_v37 = vpop.permute.xlu2 %60 }
  0x74   :  { %v27_v21 = vpop.permute.xlu1 %26  ;;  %v16_v22 = vpop.permute.xlu0 %15 }
  0x75   :  { %v30_v32 = vmul.f32 %v29_v26, %v27_v21 }
  0x79   :  { %v82_v45 = vpop.permute.xlu2 %81 }
  0x7d   :  { %v34_v27 = vpop.permute.xlu1 %33  ;;  %v20_v28 = vpop.permute.xlu0 %19 }
  0x7e   :  { %v23_v30 = vmul.f32 %v22_v25, %v20_v28  ;;  %v37_v34 = vmul.f32 %v36_v29, %v34_v27 }
  0x80   :  { %v24_v33 = vadd.f32 %v23_v30, %v16_v22 }
  0x82   :  { %v31_v35 = vadd.f32 %v30_v32, %v24_v33  ;;  %v96_v62 = vpop.permute.xlu2 %95 }
  0x84   :  { %v38_v38 = vadd.f32 %v37_v34, %v31_v35 }
  0x86   :  { %v45_v39 = vadd.f32 %v44_v36, %v38_v38  ;;  %v54_v40 = vpop.permute.xlu1 %53  ;;  %v68_v50 = vpop.permute.xlu0 %67 }
  0x88   :  { %v46_v41 = vmul.f32 0.3, %v45_v39 }
  0x8a   :  { %v47_v42 = vmax.f32 %v45_v39, %v46_v41 }
  0x8b   :  { %v112_v9 = vpop.permute.xlu2 %111 }
  0x8c   :  { %v56_v43 = vperm.slane %v47_v42, 0  ;;  %v63_v44 = vperm.slane %v47_v42, 1  ;;  %v70_v47 = vperm.slane %v47_v42, 2  ;;  %v84_v52 = vperm.slane %v47_v42, 4 }
  0x8d   :  { %v77_v55 = vperm.slane %v47_v42, 3  ;;  %v98_v60 = vperm.slane %v47_v42, 6  ;;  %v91_v61 = vperm.slane %v47_v42, 5  ;;  %v105_v4 = vperm.slane %v47_v42, 7 }
  0x8e   :  { %v57_v46 = vmul.f32 %v56_v43, %v54_v40  ;;  %v64_v51 = vmul.f32 %v63_v44, %v61_v37  ;;  %v71_v54 = vmul.f32 %v70_v47, %v68_v50  ;;  %v85_v58 = vmul.f32 %v84_v52, %v82_v45 }
  0x8f   :  { %v75_v48 = vpop.permute.xlu1 %74  ;;  %v103_v2 = vpop.permute.xlu0 %102  ;;  %v99_v3 = vmul.f32 %v98_v60, %v96_v62 }
  0x90   :  { %v58_v49 = vadd.f32 %v57_v46, %v50_v24  ;;  %v78_v57 = vmul.f32 %v77_v55, %v75_v48  ;;  %v106_v6 = vmul.f32 %v105_v4, %v103_v2 }
  0x92   :  { %v65_v53 = vadd.f32 %v64_v51, %v58_v49 }
  0x94   :  { %v72_v56 = vadd.f32 %v71_v54, %v65_v53  ;;  %v130_v17 = vpop.permute.xlu2 %129 }
  0x96   :  { %v79_v59 = vadd.f32 %v78_v57, %v72_v56 }
  0x98   :  { %v89_v63 = vpop.permute.xlu1 %88  ;;  %v86_v0 = vadd.f32 %v85_v58, %v79_v59  ;;  %v137_v22 = vpop.permute.xlu0 %136 }
  0x99   :  { %v92_v1 = vmul.f32 %v91_v61, %v89_v63 }
  0x9b   :  { %v93_v5 = vadd.f32 %v92_v1, %v86_v0 }
  0x9d   :  { %v100_v7 = vadd.f32 %v99_v3, %v93_v5 }
  0x9f   :  { %v107_v8 = vadd.f32 %v106_v6, %v100_v7 }
  0xa1   :  { %v108_v10 = vmul.f32 0.3, %v107_v8  ;;  %v116_v11 = vpop.permute.xlu1 %115 }
  0xa3   :  { %v109_v12 = vmax.f32 %v107_v8, %v108_v10 }
  0xa5   :  { %v118_v13 = vperm.slane %v109_v12, 0  ;;  %v132_v15 = vperm.slane %v109_v12, 2  ;;  %v125_v16 = vperm.slane %v109_v12, 1  ;;  %v139_v20 = vperm.slane %v109_v12, 3 }
  0xa7   :  { %v119_v14 = vmul.f32 %v118_v13, %v116_v11  ;;  %v133_v23 = vmul.f32 %v132_v15, %v130_v17  ;;  %v140_v25 = vmul.f32 %v139_v20, %v137_v22 }
  0xa9   :  { %v120_v19 = vadd.f32 %v119_v14, %v112_v9 }
  0xaa   :  { %v123_v18 = vpop.permute.xlu1 %122 }
  0xab   :  { %v126_v21 = vmul.f32 %v125_v16, %v123_v18 }
  0xad   :  { %v127_v24 = vadd.f32 %v126_v21, %v120_v19 }
  0xaf   :  { %v134_v26 = vadd.f32 %v133_v23, %v127_v24 }
  0xb1   :  { %v141_v27 = vadd.f32 %v140_v25, %v134_v26 }
  0xb3   :  { %142 = vst [vmem:[%s230_s2] sm:$0x7] %v141_v27 }

</bundles_post_ra>
